<compile_context>
chip_gen: v6e
topology: v6e:2x2x1
jax: 0.10.0
libtpu: 0.0.40
codegen_flags: <defaults>
</compile_context>

<pallas_src>
import jax
import jax.numpy as jnp
from jax import lax
from jax.experimental import pallas as pl
from jax.experimental.pallas import tpu as pltpu


_FUSED_ROWS = 128            # fused-table rows (card | rank | suit | zero pad)
_CARD_OFF = 0                # rows  0..51
_RANK_OFF = 52               # rows 52..64
_SUIT_OFF = 65               # rows 65..68
_ZERO_ROW = _FUSED_ROWS - 1  # row 127 is all zeros -> sink for invalid cards


def _round_up(x, m):
    return (x + m - 1) // m * m


def card_embedding_kernel(idx_ref, table_ref, out_ref):
    x = idx_ref[...]                          # (TB, N) int32
    tb, n_cards = x.shape
    k = table_ref.shape[0]                    # 128

    valid = x >= 0
    xc = jnp.maximum(x, 0)                    # clamp(min=0)
    card_id = jnp.where(valid, _CARD_OFF + xc, _ZERO_ROW)
    rank_id = jnp.where(valid, _RANK_OFF + (xc >> 2), _ZERO_ROW)
    suit_id = jnp.where(valid, _SUIT_OFF + (xc & 3), _ZERO_ROW)

    lane = lax.broadcasted_iota(jnp.int32, (tb, k), 1)   # (TB, 128)

    # Combined counts matrix: each valid card contributes a 1 at its card,
    # rank and suit row of the fused table.  Accumulated one small
    # (TB, 128) slab per card -- no 3-D one-hot temporary, no XLU reduce.
    counts = jnp.zeros((tb, k), jnp.float32)
    for c in range(n_cards):                  # N is small & static (e.g. 7)
        counts = counts + (lane == card_id[:, c:c + 1]).astype(jnp.float32)
        counts = counts + (lane == rank_id[:, c:c + 1]).astype(jnp.float32)
        counts = counts + (lane == suit_id[:, c:c + 1]).astype(jnp.float32)

    # Single K=128 MXU contraction against the fused table; lane-dense output.
    out_ref[...] = jnp.dot(counts, table_ref[...],
                           preferred_element_type=jnp.float32)


def card_embedding(indices, card_w, rank_w, suit_w, *, tile_b=512):
    B, N = indices.shape
    dim = card_w.shape[1]
    dim_p = _round_up(max(dim, 128), 128)     # lane-dense output width

    # Fused, zero-padded table (row 127 stays all-zero for invalid cards).
    table = jnp.zeros((_FUSED_ROWS, dim_p), jnp.float32)
    table = table.at[_CARD_OFF:_CARD_OFF + 52, :dim].set(card_w.astype(jnp.float32))
    table = table.at[_RANK_OFF:_RANK_OFF + 13, :dim].set(rank_w.astype(jnp.float32))
    table = table.at[_SUIT_OFF:_SUIT_OFF + 4, :dim].set(suit_w.astype(jnp.float32))

    # Batch tiling: pad B to a multiple of the tile (padding rows = -1 -> zero).
    tb = min(tile_b, _round_up(B, 8))
    b_pad = _round_up(B, tb)
    idx_p = jnp.full((b_pad, N), -1, dtype=jnp.int32).at[:B].set(
        indices.astype(jnp.int32))

    grid = (b_pad // tb,)
    cost = pl.CostEstimate(
        flops=2 * b_pad * _FUSED_ROWS * dim_p,
        transcendentals=0,
        bytes_accessed=b_pad * N * 4 + _FUSED_ROWS * dim_p * 4 + b_pad * dim_p * 4,
    )

    out = pl.pallas_call(
        card_embedding_kernel,
        out_shape=jax.ShapeDtypeStruct((b_pad, dim_p), jnp.float32),
        grid_spec=pltpu.PrefetchScalarGridSpec(
            num_scalar_prefetch=0,
            grid=grid,
            in_specs=[
                pl.BlockSpec((tb, N), lambda i: (i, 0)),                 # indices tile
                pl.BlockSpec((_FUSED_ROWS, dim_p), lambda i: (0, 0)),    # resident table
            ],
            out_specs=pl.BlockSpec((tb, dim_p), lambda i: (i, 0)),
        ),
        compiler_params=pltpu.CompilerParams(
            dimension_semantics=("parallel",)),
        cost_estimate=cost,
    )(idx_p, table)

    return out[:B, :dim]


def card_embedding_ref(indices, card_w, rank_w, suit_w):
    # pure-JAX reference reproducing the PyTorch forward exactly
    B, N = indices.shape
    x = indices.reshape(-1)
    valid = (x >= 0).astype(jnp.float32)
    xc = jnp.maximum(x, 0)
    embs = card_w[xc] + rank_w[xc // 4] + suit_w[xc % 4]
    embs = embs * valid[:, None]
    return embs.reshape(B, N, -1).sum(1)


if __name__ == "__main__":
    dim = 64          # embedding dim
    B = 4             # batch
    num_cards = 7     # 2 hole + 5 board cards

    key = jax.random.PRNGKey(0)
    k_idx, k_card, k_rank, k_suit = jax.random.split(key, 4)

    # deterministic "nn.Embedding"-style params: N(0, 1)
    card_w = jax.random.normal(k_card, (52, dim), dtype=jnp.float32)
    rank_w = jax.random.normal(k_rank, (13, dim), dtype=jnp.float32)
    suit_w = jax.random.normal(k_suit, (4, dim), dtype=jnp.float32)

    # card indices in [-1, 51]; -1 marks "no card" (masked out)
    indices = jax.random.randint(k_idx, (B, num_cards), -1, 52, dtype=jnp.int32)

    out = card_embedding(indices, card_w, rank_w, suit_w)
    out = jax.block_until_ready(out)

    ref = card_embedding_ref(indices, card_w, rank_w, suit_w)
    assert out.shape == (B, dim)
    assert jnp.allclose(out, ref, atol=1e-4, rtol=1e-4), "mismatch vs reference"

    print("KERNEL_OK")
</pallas_src>

<mosaic_0001>
module attributes {stable_mosaic.version = 11 : i64} {
  func.func @card_embedding_kernel(%arg0: i32, %arg1: memref<8x7xi32, #tpu.memory_space<vmem>>, %arg2: memref<128x128xf32, #tpu.memory_space<vmem>>, %arg3: memref<8x128xf32, #tpu.memory_space<vmem>>) attributes {dimension_semantics = [#tpu.dimension_semantics<parallel>], iteration_bounds = array<i64: 1>, scalar_prefetch = 0 : i64, scratch_operands = 0 : i64, tpu.core_type = #tpu.core_type<tc>, window_params = [{transform_indices = @transform_0, window_bounds = array<i64: 8, 7>}, {pipeline_mode = #tpu.pipeline_mode<synchronous>, transform_indices = @transform_1, window_bounds = array<i64: 128, 128>}, {transform_indices = @transform_2, window_bounds = array<i64: 8, 128>}]} {
    %c0 = arith.constant 0 : index
    %c0_0 = arith.constant 0 : index
    %0 = vector.load %arg1[%c0, %c0_0] : memref<8x7xi32, #tpu.memory_space<vmem>>, vector<8x7xi32>
    %c0_i32 = arith.constant 0 : i32
    %1 = vector.broadcast %c0_i32 : i32 to vector<8x7xi32>
    %2 = arith.cmpi sge, %0, %1 : vector<8x7xi32>
    %c0_i32_1 = arith.constant 0 : i32
    %3 = vector.broadcast %c0_i32_1 : i32 to vector<8x7xi32>
    %4 = arith.maxsi %0, %3 : vector<8x7xi32>
    %c0_i32_2 = arith.constant 0 : i32
    %5 = vector.broadcast %c0_i32_2 : i32 to vector<8x7xi32>
    %6 = arith.addi %5, %4 : vector<8x7xi32>
    %c127_i32 = arith.constant 127 : i32
    %7 = vector.broadcast %c127_i32 : i32 to vector<8x7xi32>
    %8 = arith.select %2, %6, %7 : vector<8x7xi1>, vector<8x7xi32>
    %c2_i32 = arith.constant 2 : i32
    %9 = vector.broadcast %c2_i32 : i32 to vector<8x7xi32>
    %10 = arith.shrsi %4, %9 : vector<8x7xi32>
    %c52_i32 = arith.constant 52 : i32
    %11 = vector.broadcast %c52_i32 : i32 to vector<8x7xi32>
    %12 = arith.addi %11, %10 : vector<8x7xi32>
    %c127_i32_3 = arith.constant 127 : i32
    %13 = vector.broadcast %c127_i32_3 : i32 to vector<8x7xi32>
    %14 = arith.select %2, %12, %13 : vector<8x7xi1>, vector<8x7xi32>
    %c3_i32 = arith.constant 3 : i32
    %15 = vector.broadcast %c3_i32 : i32 to vector<8x7xi32>
    %16 = arith.andi %4, %15 : vector<8x7xi32>
    %c65_i32 = arith.constant 65 : i32
    %17 = vector.broadcast %c65_i32 : i32 to vector<8x7xi32>
    %18 = arith.addi %17, %16 : vector<8x7xi32>
    %c127_i32_4 = arith.constant 127 : i32
    %19 = vector.broadcast %c127_i32_4 : i32 to vector<8x7xi32>
    %20 = arith.select %2, %18, %19 : vector<8x7xi1>, vector<8x7xi32>
    %21 = tpu.iota {dimensions = array<i32: 1>} : vector<8x128xi32>
    %cst = arith.constant 0.000000e+00 : f32
    %22 = vector.broadcast %cst : f32 to vector<8x128xf32>
    %23 = vector.extract_strided_slice %8 {offsets = [0, 0], sizes = [8, 1], strides = [1, 1]} : vector<8x7xi32> to vector<8x1xi32>
    %24 = vector.broadcast %23 : vector<8x1xi32> to vector<8x128xi32>
    %25 = arith.cmpi eq, %21, %24 : vector<8x128xi32>
    %26 = arith.extui %25 : vector<8x128xi1> to vector<8x128xi32>
    %27 = arith.sitofp %26 : vector<8x128xi32> to vector<8x128xf32>
    %28 = arith.addf %22, %27 : vector<8x128xf32>
    %29 = vector.extract_strided_slice %14 {offsets = [0, 0], sizes = [8, 1], strides = [1, 1]} : vector<8x7xi32> to vector<8x1xi32>
    %30 = vector.broadcast %29 : vector<8x1xi32> to vector<8x128xi32>
    %31 = arith.cmpi eq, %21, %30 : vector<8x128xi32>
    %32 = arith.extui %31 : vector<8x128xi1> to vector<8x128xi32>
    %33 = arith.sitofp %32 : vector<8x128xi32> to vector<8x128xf32>
    %34 = arith.addf %28, %33 : vector<8x128xf32>
    %35 = vector.extract_strided_slice %20 {offsets = [0, 0], sizes = [8, 1], strides = [1, 1]} : vector<8x7xi32> to vector<8x1xi32>
    %36 = vector.broadcast %35 : vector<8x1xi32> to vector<8x128xi32>
    %37 = arith.cmpi eq, %21, %36 : vector<8x128xi32>
    %38 = arith.extui %37 : vector<8x128xi1> to vector<8x128xi32>
    %39 = arith.sitofp %38 : vector<8x128xi32> to vector<8x128xf32>
    %40 = arith.addf %34, %39 : vector<8x128xf32>
    %41 = vector.extract_strided_slice %8 {offsets = [0, 1], sizes = [8, 1], strides = [1, 1]} : vector<8x7xi32> to vector<8x1xi32>
    %42 = vector.broadcast %41 : vector<8x1xi32> to vector<8x128xi32>
    %43 = arith.cmpi eq, %21, %42 : vector<8x128xi32>
    %44 = arith.extui %43 : vector<8x128xi1> to vector<8x128xi32>
    %45 = arith.sitofp %44 : vector<8x128xi32> to vector<8x128xf32>
    %46 = arith.addf %40, %45 : vector<8x128xf32>
    %47 = vector.extract_strided_slice %14 {offsets = [0, 1], sizes = [8, 1], strides = [1, 1]} : vector<8x7xi32> to vector<8x1xi32>
    %48 = vector.broadcast %47 : vector<8x1xi32> to vector<8x128xi32>
    %49 = arith.cmpi eq, %21, %48 : vector<8x128xi32>
    %50 = arith.extui %49 : vector<8x128xi1> to vector<8x128xi32>
    %51 = arith.sitofp %50 : vector<8x128xi32> to vector<8x128xf32>
    %52 = arith.addf %46, %51 : vector<8x128xf32>
    %53 = vector.extract_strided_slice %20 {offsets = [0, 1], sizes = [8, 1], strides = [1, 1]} : vector<8x7xi32> to vector<8x1xi32>
    %54 = vector.broadcast %53 : vector<8x1xi32> to vector<8x128xi32>
    %55 = arith.cmpi eq, %21, %54 : vector<8x128xi32>
    %56 = arith.extui %55 : vector<8x128xi1> to vector<8x128xi32>
    %57 = arith.sitofp %56 : vector<8x128xi32> to vector<8x128xf32>
    %58 = arith.addf %52, %57 : vector<8x128xf32>
    %59 = vector.extract_strided_slice %8 {offsets = [0, 2], sizes = [8, 1], strides = [1, 1]} : vector<8x7xi32> to vector<8x1xi32>
    %60 = vector.broadcast %59 : vector<8x1xi32> to vector<8x128xi32>
    %61 = arith.cmpi eq, %21, %60 : vector<8x128xi32>
    %62 = arith.extui %61 : vector<8x128xi1> to vector<8x128xi32>
    %63 = arith.sitofp %62 : vector<8x128xi32> to vector<8x128xf32>
    %64 = arith.addf %58, %63 : vector<8x128xf32>
    %65 = vector.extract_strided_slice %14 {offsets = [0, 2], sizes = [8, 1], strides = [1, 1]} : vector<8x7xi32> to vector<8x1xi32>
    %66 = vector.broadcast %65 : vector<8x1xi32> to vector<8x128xi32>
    %67 = arith.cmpi eq, %21, %66 : vector<8x128xi32>
    %68 = arith.extui %67 : vector<8x128xi1> to vector<8x128xi32>
    %69 = arith.sitofp %68 : vector<8x128xi32> to vector<8x128xf32>
    %70 = arith.addf %64, %69 : vector<8x128xf32>
    %71 = vector.extract_strided_slice %20 {offsets = [0, 2], sizes = [8, 1], strides = [1, 1]} : vector<8x7xi32> to vector<8x1xi32>
    %72 = vector.broadcast %71 : vector<8x1xi32> to vector<8x128xi32>
    %73 = arith.cmpi eq, %21, %72 : vector<8x128xi32>
    %74 = arith.extui %73 : vector<8x128xi1> to vector<8x128xi32>
    %75 = arith.sitofp %74 : vector<8x128xi32> to vector<8x128xf32>
    %76 = arith.addf %70, %75 : vector<8x128xf32>
    %77 = vector.extract_strided_slice %8 {offsets = [0, 3], sizes = [8, 1], strides = [1, 1]} : vector<8x7xi32> to vector<8x1xi32>
    %78 = vector.broadcast %77 : vector<8x1xi32> to vector<8x128xi32>
    %79 = arith.cmpi eq, %21, %78 : vector<8x128xi32>
    %80 = arith.extui %79 : vector<8x128xi1> to vector<8x128xi32>
    %81 = arith.sitofp %80 : vector<8x128xi32> to vector<8x128xf32>
    %82 = arith.addf %76, %81 : vector<8x128xf32>
    %83 = vector.extract_strided_slice %14 {offsets = [0, 3], sizes = [8, 1], strides = [1, 1]} : vector<8x7xi32> to vector<8x1xi32>
    %84 = vector.broadcast %83 : vector<8x1xi32> to vector<8x128xi32>
    %85 = arith.cmpi eq, %21, %84 : vector<8x128xi32>
    %86 = arith.extui %85 : vector<8x128xi1> to vector<8x128xi32>
    %87 = arith.sitofp %86 : vector<8x128xi32> to vector<8x128xf32>
    %88 = arith.addf %82, %87 : vector<8x128xf32>
    %89 = vector.extract_strided_slice %20 {offsets = [0, 3], sizes = [8, 1], strides = [1, 1]} : vector<8x7xi32> to vector<8x1xi32>
    %90 = vector.broadcast %89 : vector<8x1xi32> to vector<8x128xi32>
    %91 = arith.cmpi eq, %21, %90 : vector<8x128xi32>
    %92 = arith.extui %91 : vector<8x128xi1> to vector<8x128xi32>
    %93 = arith.sitofp %92 : vector<8x128xi32> to vector<8x128xf32>
    %94 = arith.addf %88, %93 : vector<8x128xf32>
    %95 = vector.extract_strided_slice %8 {offsets = [0, 4], sizes = [8, 1], strides = [1, 1]} : vector<8x7xi32> to vector<8x1xi32>
    %96 = vector.broadcast %95 : vector<8x1xi32> to vector<8x128xi32>
    %97 = arith.cmpi eq, %21, %96 : vector<8x128xi32>
    %98 = arith.extui %97 : vector<8x128xi1> to vector<8x128xi32>
    %99 = arith.sitofp %98 : vector<8x128xi32> to vector<8x128xf32>
    %100 = arith.addf %94, %99 : vector<8x128xf32>
    %101 = vector.extract_strided_slice %14 {offsets = [0, 4], sizes = [8, 1], strides = [1, 1]} : vector<8x7xi32> to vector<8x1xi32>
    %102 = vector.broadcast %101 : vector<8x1xi32> to vector<8x128xi32>
    %103 = arith.cmpi eq, %21, %102 : vector<8x128xi32>
    %104 = arith.extui %103 : vector<8x128xi1> to vector<8x128xi32>
    %105 = arith.sitofp %104 : vector<8x128xi32> to vector<8x128xf32>
    %106 = arith.addf %100, %105 : vector<8x128xf32>
    %107 = vector.extract_strided_slice %20 {offsets = [0, 4], sizes = [8, 1], strides = [1, 1]} : vector<8x7xi32> to vector<8x1xi32>
    %108 = vector.broadcast %107 : vector<8x1xi32> to vector<8x128xi32>
    %109 = arith.cmpi eq, %21, %108 : vector<8x128xi32>
    %110 = arith.extui %109 : vector<8x128xi1> to vector<8x128xi32>
    %111 = arith.sitofp %110 : vector<8x128xi32> to vector<8x128xf32>
    %112 = arith.addf %106, %111 : vector<8x128xf32>
    %113 = vector.extract_strided_slice %8 {offsets = [0, 5], sizes = [8, 1], strides = [1, 1]} : vector<8x7xi32> to vector<8x1xi32>
    %114 = vector.broadcast %113 : vector<8x1xi32> to vector<8x128xi32>
    %115 = arith.cmpi eq, %21, %114 : vector<8x128xi32>
    %116 = arith.extui %115 : vector<8x128xi1> to vector<8x128xi32>
    %117 = arith.sitofp %116 : vector<8x128xi32> to vector<8x128xf32>
    %118 = arith.addf %112, %117 : vector<8x128xf32>
    %119 = vector.extract_strided_slice %14 {offsets = [0, 5], sizes = [8, 1], strides = [1, 1]} : vector<8x7xi32> to vector<8x1xi32>
    %120 = vector.broadcast %119 : vector<8x1xi32> to vector<8x128xi32>
    %121 = arith.cmpi eq, %21, %120 : vector<8x128xi32>
    %122 = arith.extui %121 : vector<8x128xi1> to vector<8x128xi32>
    %123 = arith.sitofp %122 : vector<8x128xi32> to vector<8x128xf32>
    %124 = arith.addf %118, %123 : vector<8x128xf32>
    %125 = vector.extract_strided_slice %20 {offsets = [0, 5], sizes = [8, 1], strides = [1, 1]} : vector<8x7xi32> to vector<8x1xi32>
    %126 = vector.broadcast %125 : vector<8x1xi32> to vector<8x128xi32>
    %127 = arith.cmpi eq, %21, %126 : vector<8x128xi32>
    %128 = arith.extui %127 : vector<8x128xi1> to vector<8x128xi32>
    %129 = arith.sitofp %128 : vector<8x128xi32> to vector<8x128xf32>
    %130 = arith.addf %124, %129 : vector<8x128xf32>
    %131 = vector.extract_strided_slice %8 {offsets = [0, 6], sizes = [8, 1], strides = [1, 1]} : vector<8x7xi32> to vector<8x1xi32>
    %132 = vector.broadcast %131 : vector<8x1xi32> to vector<8x128xi32>
    %133 = arith.cmpi eq, %21, %132 : vector<8x128xi32>
    %134 = arith.extui %133 : vector<8x128xi1> to vector<8x128xi32>
    %135 = arith.sitofp %134 : vector<8x128xi32> to vector<8x128xf32>
    %136 = arith.addf %130, %135 : vector<8x128xf32>
    %137 = vector.extract_strided_slice %14 {offsets = [0, 6], sizes = [8, 1], strides = [1, 1]} : vector<8x7xi32> to vector<8x1xi32>
    %138 = vector.broadcast %137 : vector<8x1xi32> to vector<8x128xi32>
    %139 = arith.cmpi eq, %21, %138 : vector<8x128xi32>
    %140 = arith.extui %139 : vector<8x128xi1> to vector<8x128xi32>
    %141 = arith.sitofp %140 : vector<8x128xi32> to vector<8x128xf32>
    %142 = arith.addf %136, %141 : vector<8x128xf32>
    %143 = vector.extract_strided_slice %20 {offsets = [0, 6], sizes = [8, 1], strides = [1, 1]} : vector<8x7xi32> to vector<8x1xi32>
    %144 = vector.broadcast %143 : vector<8x1xi32> to vector<8x128xi32>
    %145 = arith.cmpi eq, %21, %144 : vector<8x128xi32>
    %146 = arith.extui %145 : vector<8x128xi1> to vector<8x128xi32>
    %147 = arith.sitofp %146 : vector<8x128xi32> to vector<8x128xf32>
    %148 = arith.addf %142, %147 : vector<8x128xf32>
    %c0_5 = arith.constant 0 : index
    %c0_6 = arith.constant 0 : index
    %149 = vector.load %arg2[%c0_5, %c0_6] : memref<128x128xf32, #tpu.memory_space<vmem>>, vector<128x128xf32>
    %cst_7 = arith.constant dense<0.000000e+00> : vector<8x128xf32>
    %150 = tpu.matmul %148, %149, %cst_7 {dimension_numbers = #tpu.dot_dimension_numbers<[1], [0], [0], [1], [0, 0, 1, 1], [], []>} : vector<8x128xf32>, vector<128x128xf32>, vector<8x128xf32> -> vector<8x128xf32>
    %c0_8 = arith.constant 0 : index
    %c0_9 = arith.constant 0 : index
    %151 = vector.load %arg3[%c0_8, %c0_9] : memref<8x128xf32, #tpu.memory_space<vmem>>, vector<8x128xf32>
    tpu.vector_store %arg3[%c0_8, %c0_9], %150 {strides = array<i32>} : memref<8x128xf32, #tpu.memory_space<vmem>>, vector<8x128xf32>,
    return
  }
  func.func @transform_0(%arg0: i32) -> (i32, i32) {
    %c0_i32 = arith.constant 0 : i32
    %c0_i32_0 = arith.constant 0 : i32
    return %arg0, %c0_i32 : i32, i32
  }
  func.func @transform_1(%arg0: i32) -> (i32, i32) {
    %c0_i32 = arith.constant 0 : i32
    %c0_i32_0 = arith.constant 0 : i32
    %c0_i32_1 = arith.constant 0 : i32
    return %c0_i32, %c0_i32_0 : i32, i32
  }
  func.func @transform_2(%arg0: i32) -> (i32, i32) {
    %c0_i32 = arith.constant 0 : i32
    %c0_i32_0 = arith.constant 0 : i32
    return %arg0, %c0_i32 : i32, i32
  }
}

</mosaic_0001>

<bundles_post_ra>
// kernel: tpu_custom_call.1
= control target key start
LH: loop header
LB: loop body
LE: loop exit
PB: predicated region body
PF: predicated region fallthrough
CT: control target
= control target key end

     0   :  { %7 = vsyncpa [#allocation3], 0  ;;  %s587_s0 = inlined_call_operand.hbm [shape: s32[8,7], index: 0, kind: input, shape index: {}]   ;;  %s588_s1 = inlined_call_operand.hbm [shape: f32[128,128], index: 1, kind: input, shape index: {}]   ;;  %s589_s2 = inlined_call_operand.hbm [shape: f32[8,128], index: 2, kind: output, shape index: {}]  }
   0x1   :  { %8 = vsyncpa [#allocation6], 0 }
   0x2   :  { %9 = vsyncpa [#allocation4], 0  ;;  %s470_s9 = smov [#allocation2]   ;;  %s471_s11 = smov [#allocation5]  }
   0x3   :  { %s16_s10 = sshll.u32 %s470_s9, 4  ;;  %s25_s12 = sshll.u32 %s471_s11, 4  ;;  %s17_s10 = int_to_ptr.vmem [resolvable:$true] %s16_s10  ;;  %s26_s12 = int_to_ptr.vmem [resolvable:$true] %s25_s12 }
   0x4   :  { %s412_s13 = scalar_lea.vmem %s17_s10, 128  ;;  %p417_p1 = scmp.lt.s32.totalorder %s17_s10, %s17_s10 }
   0x5   :  { %p413_p0 = scmp.ne.s32.totalorder %s17_s10, %s412_s13  ;;  %p418_p2 = scmp.lt.s32.totalorder %s412_s13, %s412_s13 }
   0x7   :  { %p419_p3 = por %p418_p2, %p417_p1 }
   0x9   :  { %p420_p4 = pnand %p419_p3, %p413_p0 }
   0xb   :  { %423 = shalt.err (!%p420_p4)
}
   0xc   :  { %19 = dma.hbm_to_vmem [thread:$0]  %s587_s0, 128, %s17_s10, [#allocation3]  }
   0xd   :  { %s432_s16 = scalar_lea.vmem %s26_s12, 2048  ;;  %p437_p6 = scmp.lt.s32.totalorder %s26_s12, %s26_s12 }
   0xe   :  { %p433_p5 = scmp.ne.s32.totalorder %s26_s12, %s432_s16  ;;  %p438_p7 = scmp.lt.s32.totalorder %s432_s16, %s432_s16 }
  0x10   :  { %p439_p8 = por %p438_p7, %p437_p6 }
  0x12   :  { %p440_p9 = pnand %p439_p8, %p433_p5 }
  0x14   :  { %443 = shalt.err (!%p440_p9)
}
  0x15   :  { %s472_s17 = smov 128   ;;  %s473_s18 = smov 8  }
  0x16   :  { %31 = dma.hbm_to_vmem [thread:$0]  %s588_s1, 2048, %s26_s12, [#allocation6], %s472_s17, %s472_s17, %s473_s18  }
  0x17   :  { %464 = dma.done.wait [#allocation3], 128  }
  0x18   :  { %465 = vsyncadd [#allocation3], 4294967168 }
  0x19   :  { %466 = dma.done.wait [#allocation6], 2048  }
  0x1a   :  { %467 = vsyncadd [#allocation6], 4294965248  ;;  %v474_v0 = vmov 1   ;;  %v475_v1 = vmov 0   ;;  %v476_v2 = vmov 0.0   ;;  %v38_v3 = vld [vmem:[#allocation2] sm:$0xff]  ;;  %v49_v33 = vlaneseq }
  0x1b   :  { %389 = vset.pattern.permute.xlu1 %v474_v0  ;;  %388 = vset.pattern.permute.xlu0 %v475_v1  ;;  %vm39_vm0 = vcmp.ge.s32.totalorder %v38_v3, 0  ;;  %vm40_vm1 = vcmp.gt.s32.totalorder %v38_v3, 0  ;;  %v477_v11 = vmov 2   ;;  %v478_v13 = vmov 3   ;;  %v213_v15 = vld [vmem:[#allocation5 + $0x78] sm:$0xff]  ;;  %v212_v16 = vld [vmem:[#allocation5 + $0x70] sm:$0xff] }
  0x1c   :  { %339 = vmatprep.subr.mxu0 %v476_v2  ;;  %v41_v4 = vsel %vm40_vm1, %v38_v3, 0  ;;  %v479_v14 = vmov 4   ;;  %v211_v17 = vld [vmem:[#allocation5 + $0x68] sm:$0xff]  ;;  %v480_v18 = vmov 5   ;;  %v210_v19 = vld [vmem:[#allocation5 + $0x60] sm:$0xff]  ;;  %v481_v20 = vmov 6  }
  0x1d   :  { %v506_v5 = vsel %vm39_vm0, %v41_v4, 127  ;;  %v43_v6 = vshra.s32 %v41_v4, 2  ;;  %v46_v7 = vand.u32 3, %v41_v4  ;;  %340 = vmatpush3.msra.mxu0 %v213_v15  ;;  %v209_v21 = vld [vmem:[#allocation5 + $0x58] sm:$0xff]  ;;  %v208_v22 = vld [vmem:[#allocation5 + $0x50] sm:$0xff]  ;;  %v207_v23 = vld [vmem:[#allocation5 + $0x48] sm:$0xff] }
  0x1e   :  { %73 = vperm.xlu1 %389, %v506_v5   ;;  %52 = vperm.xlu0 %388, %v506_v5   ;;  %v206_v24 = vld [vmem:[#allocation5 + $0x40] sm:$0xff]  ;;  %v205_v25 = vld [vmem:[#allocation5 + $0x38] sm:$0xff]  ;;  %v204_v26 = vld [vmem:[#allocation5 + $0x30] sm:$0xff]  ;;  %vm482_vm2 = vmmov 0   ;;  %v540_v36 = vand.u32 127, %v49_v33  ;;  %s483_s0 = smov [#allocation7]  }
  0x1f   :  { %v44_v8 = vadd.s32 52, %v43_v6  ;;  %v47_v10 = vadd.s32 65, %v46_v7  ;;  %341 = vmatprep.subr.mxu0 %v476_v2  ;;  %v203_v27 = vld [vmem:[#allocation5 + $0x28] sm:$0xff]  ;;  %v202_v28 = vld [vmem:[#allocation5 + $0x20] sm:$0xff]  ;;  %v201_v29 = vld [vmem:[#allocation5 + $0x18] sm:$0xff]  ;;  %371 = vmatprep.mubr.msk.f32.mxu0 %vm482_vm2, %v476_v2  ;;  %s291_s1 = sshll.u32 %s483_s0, 4  ;;  %s292_s1 = int_to_ptr.vmem [resolvable:$true] %s291_s1 }
  0x20   :  { %342 = vmatpush3.msra.mxu0 %v212_v16  ;;  %v200_v30 = vld [vmem:[#allocation5 + $0x10] sm:$0xff]  ;;  %v199_v31 = vld [vmem:[#allocation5 + $0x8] sm:$0xff]  ;;  %v198_v32 = vld [vmem:[#allocation5] sm:$0xff]  ;;  %s444_s21 = scalar_lea.vmem %s292_s1, 128  ;;  %p449_p11 = scmp.lt.s32.totalorder %s292_s1, %s292_s1 }
  0x21   :  { %v45_v9 = vsel %vm39_vm0, %v44_v8, 127  ;;  %v511_v12 = vsel %vm39_vm0, %v47_v10, 127  ;;  %343 = vmatprep.subr.mxu0 %v476_v2  ;;  %p445_p10 = scmp.ne.s32.totalorder %s292_s1, %s444_s21  ;;  %p450_p12 = scmp.lt.s32.totalorder %s444_s21, %s444_s21 }
  0x22   :  { %390 = vset.pattern.permute.xlu1 %v477_v11  ;;  %59 = vperm.xlu0 %388, %v45_v9  }
  0x23   :  { %94 = vperm.xlu1 %390, %v506_v5   ;;  %344 = vmatpush3.msra.mxu0 %v211_v17  ;;  %p451_p13 = por %p450_p12, %p449_p11 }
  0x24   :  { %345 = vmatprep.subr.mxu0 %v476_v2 }
  0x25   :  { %346 = vmatpush3.msra.mxu0 %v210_v19  ;;  %p452_p0 = pnand %p451_p13, %p445_p10 }
  0x26   :  { %392 = vset.pattern.permute.xlu0 %v474_v0  ;;  %347 = vmatprep.subr.mxu0 %v476_v2 }
  0x27   :  { %391 = vset.pattern.permute.xlu1 %v475_v1  ;;  %80 = vperm.xlu0 %392, %v45_v9  }
  0x28   :  { %66 = vperm.xlu1 %391, %v511_v12   ;;  %348 = vmatpush3.msra.mxu0 %v209_v21 }
  0x29   :  { %349 = vmatprep.subr.mxu0 %v476_v2 }
  0x2a   :  { %350 = vmatpush3.msra.mxu0 %v208_v22 }
  0x2b   :  { %394 = vset.pattern.permute.xlu0 %v477_v11  ;;  %351 = vmatprep.subr.mxu0 %v476_v2 }
  0x2c   :  { %393 = vset.pattern.permute.xlu1 %v474_v0  ;;  %101 = vperm.xlu0 %394, %v45_v9  }
  0x2d   :  { %87 = vperm.xlu1 %393, %v511_v12   ;;  %352 = vmatpush3.msra.mxu0 %v207_v23 }
  0x2e   :  { %353 = vmatprep.subr.mxu0 %v476_v2 }
  0x2f   :  { %354 = vmatpush3.msra.mxu0 %v206_v24 }
  0x30   :  { %397 = vset.pattern.permute.xlu0 %v478_v13  ;;  %355 = vmatprep.subr.mxu0 %v476_v2 }
  0x31   :  { %395 = vset.pattern.permute.xlu1 %v477_v11  ;;  %122 = vperm.xlu0 %397, %v45_v9  }
  0x32   :  { %108 = vperm.xlu1 %395, %v511_v12   ;;  %356 = vmatpush3.msra.mxu0 %v205_v25 }
  0x33   :  { %357 = vmatprep.subr.mxu0 %v476_v2 }
  0x34   :  { %358 = vmatpush3.msra.mxu0 %v204_v26 }
  0x35   :  { %399 = vset.pattern.permute.xlu0 %v479_v14  ;;  %359 = vmatprep.subr.mxu0 %v476_v2 }
  0x36   :  { %396 = vset.pattern.permute.xlu1 %v478_v13  ;;  %143 = vperm.xlu0 %399, %v45_v9  }
  0x37   :  { %115 = vperm.xlu1 %396, %v506_v5   ;;  %360 = vmatpush3.msra.mxu0 %v203_v27 }
  0x38   :  { %361 = vmatprep.subr.mxu0 %v476_v2 }
  0x39   :  { %362 = vmatpush3.msra.mxu0 %v202_v28 }
  0x3a   :  { %401 = vset.pattern.permute.xlu0 %v480_v18  ;;  %363 = vmatprep.subr.mxu0 %v476_v2 }
  0x3b   :  { %129 = vperm.xlu1 %396, %v511_v12   ;;  %164 = vperm.xlu0 %401, %v45_v9  }
  0x3c   :  { %364 = vmatpush3.msra.mxu0 %v201_v29 }
  0x3d   :  { %365 = vmatprep.subr.mxu0 %v476_v2 }
  0x3e   :  { %366 = vmatpush3.msra.mxu0 %v200_v30 }
  0x3f   :  { %398 = vset.pattern.permute.xlu1 %v479_v14  ;;  %403 = vset.pattern.permute.xlu0 %v481_v20 }
  0x40   :  { %136 = vperm.xlu1 %398, %v506_v5   ;;  %185 = vperm.xlu0 %403, %v45_v9  }
  0x41   :  { %367 = vmatprep.subr.mxu0 %v476_v2 }
  0x42   :  { %368 = vmatpush3.msra.mxu0 %v199_v31 }
  0x43   :  { %369 = vmatprep.subr.mxu0 %v476_v2 }
  0x44   :  { %150 = vperm.xlu1 %398, %v511_v12   ;;  %370 = vmatpush3.msra.mxu0 %v198_v32 }
  0x48   :  { %400 = vset.pattern.permute.xlu1 %v480_v18 }
  0x49   :  { %157 = vperm.xlu1 %400, %v506_v5  }
  0x4d   :  { %171 = vperm.xlu1 %400, %v511_v12  }
  0x51   :  { %402 = vset.pattern.permute.xlu1 %v481_v20 }
  0x52   :  { %178 = vperm.xlu1 %402, %v506_v5  }
  0x56   :  { %192 = vperm.xlu1 %402, %v511_v12  }
  0x99   :  { %v74_v34 = vpop.permute.xlu1 %73  ;;  %v53_v35 = vpop.permute.xlu0 %52 }
  0x9a   :  { %vm54_vm3 = vcmp.eq.s32.totalorder %v540_v36, %v53_v35  ;;  %vm75_vm5 = vcmp.eq.s32.totalorder %v540_v36, %v74_v34 }
  0x9b   :  { %v301_v39 = vsel %vm54_vm3, 1.0, %v476_v2  ;;  %v304_v46 = vsel %vm75_vm5, 1.0, %v476_v2 }
  0x9d   :  { %v60_v37 = vpop.permute.xlu0 %59 }
  0x9e   :  { %v95_v38 = vpop.permute.xlu1 %94  ;;  %vm61_vm4 = vcmp.eq.s32.totalorder %v540_v36, %v60_v37 }
  0x9f   :  { %v302_v40 = vsel %vm61_vm4, 1.0, %v476_v2  ;;  %vm96_vm9 = vcmp.eq.s32.totalorder %v540_v36, %v95_v38 }
  0xa0   :  { %v64_v41 = vadd.f32 %v302_v40, %v301_v39  ;;  %v307_v54 = vsel %vm96_vm9, 1.0, %v476_v2 }
  0xa2   :  { %v81_v42 = vpop.permute.xlu0 %80 }
  0xa3   :  { %v67_v43 = vpop.permute.xlu1 %66  ;;  %vm82_vm7 = vcmp.eq.s32.totalorder %v540_v36, %v81_v42 }
  0xa4   :  { %vm68_vm6 = vcmp.eq.s32.totalorder %v540_v36, %v67_v43  ;;  %v305_v47 = vsel %vm82_vm7, 1.0, %v476_v2 }
  0xa5   :  { %v303_v44 = vsel %vm68_vm6, 1.0, %v476_v2 }
  0xa6   :  { %v71_v45 = vadd.f32 %v303_v44, %v64_v41 }
  0xa7   :  { %v102_v48 = vpop.permute.xlu0 %101 }
  0xa8   :  { %v78_v49 = vadd.f32 %v304_v46, %v71_v45  ;;  %v88_v50 = vpop.permute.xlu1 %87  ;;  %vm103_vm10 = vcmp.eq.s32.totalorder %v540_v36, %v102_v48 }
  0xa9   :  { %vm89_vm8 = vcmp.eq.s32.totalorder %v540_v36, %v88_v50  ;;  %v308_v56 = vsel %vm103_vm10, 1.0, %v476_v2 }
  0xaa   :  { %v85_v51 = vadd.f32 %v305_v47, %v78_v49  ;;  %v306_v52 = vsel %vm89_vm8, 1.0, %v476_v2 }
  0xac   :  { %v92_v53 = vadd.f32 %v306_v52, %v85_v51  ;;  %v123_v58 = vpop.permute.xlu0 %122 }
  0xad   :  { %v109_v55 = vpop.permute.xlu1 %108  ;;  %vm124_vm12 = vcmp.eq.s32.totalorder %v540_v36, %v123_v58 }
  0xae   :  { %vm110_vm11 = vcmp.eq.s32.totalorder %v540_v36, %v109_v55  ;;  %v99_v57 = vadd.f32 %v307_v54, %v92_v53  ;;  %v311_v1 = vsel %vm124_vm12, 1.0, %v476_v2 }
  0xaf   :  { %v309_v60 = vsel %vm110_vm11, 1.0, %v476_v2 }
  0xb0   :  { %v106_v59 = vadd.f32 %v308_v56, %v99_v57 }
  0xb1   :  { %v144_v5 = vpop.permute.xlu0 %143 }
  0xb2   :  { %v116_v61 = vpop.permute.xlu1 %115  ;;  %v113_v62 = vadd.f32 %v309_v60, %v106_v59  ;;  %vm145_vm15 = vcmp.eq.s32.totalorder %v540_v36, %v144_v5 }
  0xb3   :  { %vm117_vm13 = vcmp.eq.s32.totalorder %v540_v36, %v116_v61  ;;  %v314_v11 = vsel %vm145_vm15, 1.0, %v476_v2 }
  0xb4   :  { %v310_v63 = vsel %vm117_vm13, 1.0, %v476_v2 }
  0xb5   :  { %v120_v0 = vadd.f32 %v310_v63, %v113_v62 }
  0xb6   :  { %v130_v3 = vpop.permute.xlu1 %129  ;;  %v165_v14 = vpop.permute.xlu0 %164 }
  0xb7   :  { %vm131_vm14 = vcmp.eq.s32.totalorder %v540_v36, %v130_v3  ;;  %v127_v4 = vadd.f32 %v311_v1, %v120_v0  ;;  %vm166_vm2 = vcmp.eq.s32.totalorder %v540_v36, %v165_v14 }
  0xb8   :  { %v312_v6 = vsel %vm131_vm14, 1.0, %v476_v2  ;;  %v317_v20 = vsel %vm166_vm2, 1.0, %v476_v2 }
  0xb9   :  { %v134_v8 = vadd.f32 %v312_v6, %v127_v4 }
  0xbb   :  { %v137_v7 = vpop.permute.xlu1 %136  ;;  %v186_v22 = vpop.permute.xlu0 %185 }
  0xbc   :  { %vm138_vm0 = vcmp.eq.s32.totalorder %v540_v36, %v137_v7  ;;  %vm187_vm5 = vcmp.eq.s32.totalorder %v540_v36, %v186_v22 }
  0xbd   :  { %v313_v9 = vsel %vm138_vm0, 1.0, %v476_v2  ;;  %v320_v28 = vsel %vm187_vm5, 1.0, %v476_v2 }
  0xbe   :  { %v141_v10 = vadd.f32 %v313_v9, %v134_v8 }
  0xbf   :  { %v151_v12 = vpop.permute.xlu1 %150 }
  0xc0   :  { %vm152_vm1 = vcmp.eq.s32.totalorder %v540_v36, %v151_v12  ;;  %v148_v13 = vadd.f32 %v314_v11, %v141_v10 }
  0xc1   :  { %v315_v15 = vsel %vm152_vm1, 1.0, %v476_v2 }
  0xc2   :  { %v155_v17 = vadd.f32 %v315_v15, %v148_v13 }
  0xc4   :  { %v158_v16 = vpop.permute.xlu1 %157 }
  0xc5   :  { %vm159_vm3 = vcmp.eq.s32.totalorder %v540_v36, %v158_v16 }
  0xc6   :  { %v316_v18 = vsel %vm159_vm3, 1.0, %v476_v2 }
  0xc7   :  { %v162_v19 = vadd.f32 %v316_v18, %v155_v17 }
  0xc8   :  { %v172_v21 = vpop.permute.xlu1 %171 }
  0xc9   :  { %vm173_vm4 = vcmp.eq.s32.totalorder %v540_v36, %v172_v21  ;;  %v169_v23 = vadd.f32 %v317_v20, %v162_v19 }
  0xca   :  { %v318_v24 = vsel %vm173_vm4, 1.0, %v476_v2 }
  0xcb   :  { %v176_v26 = vadd.f32 %v318_v24, %v169_v23 }
  0xcd   :  { %v179_v25 = vpop.permute.xlu1 %178 }
  0xce   :  { %vm180_vm6 = vcmp.eq.s32.totalorder %v540_v36, %v179_v25 }
  0xcf   :  { %v319_v27 = vsel %vm180_vm6, 1.0, %v476_v2 }
  0xd0   :  { %v183_v29 = vadd.f32 %v319_v27, %v176_v26 }
  0xd1   :  { %v193_v30 = vpop.permute.xlu1 %192 }
  0xd2   :  { %v190_v31 = vadd.f32 %v320_v28, %v183_v29  ;;  %vm194_vm7 = vcmp.eq.s32.totalorder %v540_v36, %v193_v30 }
  0xd3   :  { %v321_v32 = vsel %vm194_vm7, 1.0, %v476_v2 }
  0xd4   :  { %v197_v33 = vadd.f32 %v321_v32, %v190_v31 }
  0xd6   :  { %372 = vmatmul.mubr.f32.vlgmr.msra.gmra.mxu0 %v197_v33 }
 0x196   :  { %v280_v34 = vpop.f32.mrf.mxu0 }
 0x197   :  { %284 = vst [vmem:[#allocation7] sm:$0xff] %v280_v34 }
 0x198   :  { %v373_v35 = vpop.f32.mrf.mxu0 }
 0x199   :  { %455 = shalt.err (!%p452_p0)
}
 0x19a   :  { %294 = dma.vmem_to_hbm [thread:$0]  %s292_s1, 128, %s589_s2, [#allocation4]  }
 0x19b   :  { %468 = dma.done.wait [#allocation4], 128  }
 0x19c   :  { %469 = vsyncadd [#allocation4], 4294967168 }
 0x19d   :  { %298 = vsyncpa [#allocation3], 1 }
 0x19e   :  { %299 = vsyncpa [#allocation6], 1 }
 0x19f   :  { %300 = vsyncpa [#allocation4], 1 }

</bundles_post_ra>
